<compile_context>
chip_gen: v6e
topology: v6e:2x2x1
jax: 0.10.0
libtpu: 0.0.40
codegen_flags: <defaults>
</compile_context>

<pallas_src>
import inspect

import jax
import jax.numpy as jnp
from jax.experimental import pallas as pl
from jax.experimental.pallas import tpu as pltpu

O_PAD = 128  # pad the 3-wide class dim to a full lane slab for an unmasked vst


def mlp_kernel(x_ref, w1_ref, b1_ref, w2_ref, b2_ref, o_ref):
    # In-kernel f32 -> bf16 cast of the activations (VPU cast hides under the MXU).
    x_bf = x_ref[...].astype(jnp.bfloat16)
    # First linear: bf16 MXU matmul, f32 accumulate; bias + ReLU epilogue in f32.
    h = jnp.dot(x_bf, w1_ref[...], preferred_element_type=jnp.float32)
    h = jnp.maximum(h + b1_ref[...], 0.0)                       # (tile_b, H) f32
    # Dropout(0.1): identity at inference time.
    # TODO(synk): training-mode dropout would need pltpu.prng_seed / prng_random_bits.
    out = jnp.dot(h.astype(jnp.bfloat16), w2_ref[...],
                  preferred_element_type=jnp.float32)
    o_ref[...] = (out + b2_ref[...]).astype(o_ref.dtype)        # lane-dense f32 store


# pipeline_mode / pl.Buffered only exist in newer jax versions; degrade gracefully.
_HAS_PIPELINE_MODE = hasattr(pl, "Buffered") and (
    "pipeline_mode" in inspect.signature(pl.BlockSpec).parameters
)


def _resident_spec(block_shape):
    """BlockSpec for a grid-invariant (weight/bias) operand: single-buffered."""
    if _HAS_PIPELINE_MODE:
        return pl.BlockSpec(block_shape, lambda i: (0, 0),
                            pipeline_mode=pl.Buffered(1))
    return pl.BlockSpec(block_shape, lambda i: (0, 0))


def _device_kind():
    try:
        return jax.devices()[0].device_kind.lower()
    except Exception:
        return ""


def _num_tensorcores(kind):
    """Best-effort TensorCores per addressable device (v4/v5p megacore, v7x => 2)."""
    if not kind:
        return 1
    if "lite" in kind or "v5e" in kind or "v6e" in kind or "v6" in kind:
        return 1
    if "v7" in kind or "v4" in kind or "v5p" in kind or kind.strip() == "tpu v5":
        return 2
    return 1


_KIND = _device_kind()
_NUM_TC = _num_tensorcores(_KIND)
_IS_V7X = "v7" in _KIND


def _preferred_semantics():
    # Only CORE_PARALLEL actually changes core sharding on v7x; "parallel" elsewhere.
    if _IS_V7X and hasattr(pltpu, "CORE_PARALLEL"):
        return (pltpu.CORE_PARALLEL,)
    return ("parallel",)


def _round_up(x, m):
    return (x + m - 1) // m * m


def _choose_tile_b(B, num_cores, sublane=8, max_tile=1024):
    """One full-batch tile on single-TC chips; ~even 2-way split on 2-TC chips."""
    if B <= sublane:
        return B
    if num_cores <= 1:
        # Grid is a serial loop on one TC: splitting only adds ~0.35us/step overhead.
        return min(B, max_tile)
    half = _round_up(pl.cdiv(B, 2), sublane)
    return min(max_tile, half, B)


def prepare_params(w1_t, b1, w2_t, b2):
    """One-time parameter prep: bf16 MXU operands, f32 biases, lane-padded class dim."""
    H, O = w2_t.shape
    w1_bf = w1_t.astype(jnp.bfloat16)
    b1_2d = b1.reshape(1, -1).astype(jnp.float32)
    w2_pad = (jnp.zeros((H, O_PAD), jnp.bfloat16)
              .at[:, :O].set(w2_t.astype(jnp.bfloat16)))
    b2_pad = jnp.zeros((1, O_PAD), jnp.float32).at[:, :O].set(b2.astype(jnp.float32))
    return w1_bf, b1_2d, w2_pad, b2_pad, O


def unstructured_classifier_forward(x, params, *, tile_b=None):
    """x: [B, D] f32, params from prepare_params() -> f32 logits [B, num_classes]."""
    w1_bf, b1_2d, w2_pad, b2_pad, num_classes = params
    B, D = x.shape
    H = w1_bf.shape[1]

    if tile_b is None:
        tile_b = _choose_tile_b(B, _NUM_TC)

    grid = (pl.cdiv(B, tile_b),)

    cost = pl.CostEstimate(
        flops=2 * B * (D * H + H * O_PAD),
        transcendentals=0,
        bytes_accessed=(x.size * 4 + w1_bf.size * 2 + b1_2d.size * 4
                        + w2_pad.size * 2 + b2_pad.size * 4 + B * O_PAD * 4),
    )

    def run(semantics):
        return pl.pallas_call(
            mlp_kernel,
            out_shape=jax.ShapeDtypeStruct((B, O_PAD), jnp.float32),
            grid_spec=pltpu.PrefetchScalarGridSpec(
                num_scalar_prefetch=0,
                grid=grid,
                in_specs=[
                    pl.BlockSpec((tile_b, D), lambda i: (i, 0)),  # x stream (f32)
                    _resident_spec((D, H)),                        # W1^T bf16 (resident)
                    _resident_spec((1, H)),                        # b1 f32    (resident)
                    _resident_spec((H, O_PAD)),                    # W2^T bf16 (resident, padded)
                    _resident_spec((1, O_PAD)),                    # b2 f32    (resident, padded)
                ],
                out_specs=pl.BlockSpec((tile_b, O_PAD), lambda i: (i, 0)),
            ),
            compiler_params=pltpu.CompilerParams(
                dimension_semantics=semantics,
                vmem_limit_bytes=32 * 1024 * 1024,
            ),
            cost_estimate=cost,
        )(x, w1_bf, b1_2d, w2_pad, b2_pad)

    semantics = _preferred_semantics()
    try:
        out_padded = run(semantics)
    except Exception:
        if semantics == ("parallel",):
            raise
        out_padded = run(("parallel",))  # safe fallback if CORE_PARALLEL won't lower

    # TODO(synk): for very large D*H (esp. v7x's 64 MiB VMEM), add a K-reduction grid axis
    # ("arbitrary") with an f32 VMEM accumulator instead of a fully resident W1.
    return out_padded[:, :num_classes]


def init_params(key, input_size, hidden_size, out_size=3):
    """Deterministic init mimicking nn.Linear's U(-1/sqrt(fan_in), 1/sqrt(fan_in))."""
    k1, k2, k3, k4 = jax.random.split(key, 4)
    bound1 = 1.0 / jnp.sqrt(input_size)
    bound2 = 1.0 / jnp.sqrt(hidden_size)
    # PyTorch stores W as [out, in]; we keep the transposed [in, out] form.
    w1_t = jax.random.uniform(k1, (input_size, hidden_size), jnp.float32,
                              -bound1, bound1)
    b1 = jax.random.uniform(k2, (hidden_size,), jnp.float32, -bound1, bound1)
    w2_t = jax.random.uniform(k3, (hidden_size, out_size), jnp.float32,
                              -bound2, bound2)
    b2 = jax.random.uniform(k4, (out_size,), jnp.float32, -bound2, bound2)
    return w1_t, b1, w2_t, b2


if __name__ == "__main__":
    # Module defaults: input_size=768, hidden_size=256, 3 classes; small batch for the demo.
    B, INPUT_SIZE, HIDDEN_SIZE = 64, 768, 256

    key = jax.random.PRNGKey(0)
    k_x, k_p = jax.random.split(key)
    x = jax.random.normal(k_x, (B, INPUT_SIZE), dtype=jnp.float32)
    w1_t, b1, w2_t, b2 = init_params(k_p, INPUT_SIZE, HIDDEN_SIZE)

    params = prepare_params(w1_t, b1, w2_t, b2)  # one-time bf16 cast + lane padding

    logits = unstructured_classifier_forward(x, params)
    logits = jax.block_until_ready(logits)

    # Pure-JAX reference in the same mixed precision (bf16 matmuls, f32 accumulate).
    xb = x.astype(jnp.bfloat16)
    h_ref = jnp.maximum(
        jnp.dot(xb, w1_t.astype(jnp.bfloat16),
                preferred_element_type=jnp.float32) + b1, 0.0)
    ref = jnp.dot(h_ref.astype(jnp.bfloat16), w2_t.astype(jnp.bfloat16),
                  preferred_element_type=jnp.float32) + b2

    assert logits.shape == (B, 3)
    assert logits.dtype == jnp.float32
    assert jnp.allclose(logits, ref, atol=2e-2, rtol=2e-2)

    print("KERNEL_OK")
</pallas_src>

<mosaic_0001>
module attributes {stable_mosaic.version = 11 : i64} {
  func.func @mlp_kernel(%arg0: i32, %arg1: memref<64x768xf32, #tpu.memory_space<vmem>>, %arg2: memref<768x256xbf16, #tpu.memory_space<vmem>>, %arg3: memref<1x256xf32, #tpu.memory_space<vmem>>, %arg4: memref<256x128xbf16, #tpu.memory_space<vmem>>, %arg5: memref<1x128xf32, #tpu.memory_space<vmem>>, %arg6: memref<64x128xf32, #tpu.memory_space<vmem>>) attributes {dimension_semantics = [#tpu.dimension_semantics<parallel>], iteration_bounds = array<i64: 1>, scalar_prefetch = 0 : i64, scratch_operands = 0 : i64, tpu.core_type = #tpu.core_type<tc>, window_params = [{transform_indices = @transform_0, window_bounds = array<i64: 64, 768>}, {pipeline_mode = #tpu.pipeline_mode<synchronous>, transform_indices = @transform_1, window_bounds = array<i64: 768, 256>}, {pipeline_mode = #tpu.pipeline_mode<synchronous>, transform_indices = @transform_2, window_bounds = array<i64: 1, 256>}, {pipeline_mode = #tpu.pipeline_mode<synchronous>, transform_indices = @transform_3, window_bounds = array<i64: 256, 128>}, {pipeline_mode = #tpu.pipeline_mode<synchronous>, transform_indices = @transform_4, window_bounds = array<i64: 1, 128>}, {transform_indices = @transform_5, window_bounds = array<i64: 64, 128>}]} {
    %c0 = arith.constant 0 : index
    %c0_0 = arith.constant 0 : index
    %0 = vector.load %arg1[%c0, %c0_0] : memref<64x768xf32, #tpu.memory_space<vmem>>, vector<64x768xf32>
    %1 = arith.truncf %0 : vector<64x768xf32> to vector<64x768xbf16>
    %c0_1 = arith.constant 0 : index
    %c0_2 = arith.constant 0 : index
    %2 = vector.load %arg2[%c0_1, %c0_2] : memref<768x256xbf16, #tpu.memory_space<vmem>>, vector<768x256xbf16>
    %cst = arith.constant dense<0.000000e+00> : vector<64x256xf32>
    %3 = tpu.matmul %1, %2, %cst {dimension_numbers = #tpu.dot_dimension_numbers<[1], [0], [0], [1], [0, 0, 1, 1], [], []>} : vector<64x768xbf16>, vector<768x256xbf16>, vector<64x256xf32> -> vector<64x256xf32>
    %c0_3 = arith.constant 0 : index
    %c0_4 = arith.constant 0 : index
    %4 = vector.load %arg3[%c0_3, %c0_4] : memref<1x256xf32, #tpu.memory_space<vmem>>, vector<1x256xf32>
    %5 = vector.broadcast %4 : vector<1x256xf32> to vector<64x256xf32>
    %6 = arith.addf %3, %5 : vector<64x256xf32>
    %cst_5 = arith.constant 0.000000e+00 : f32
    %7 = vector.broadcast %cst_5 : f32 to vector<64x256xf32>
    %8 = arith.maximumf %6, %7 : vector<64x256xf32>
    %9 = arith.truncf %8 : vector<64x256xf32> to vector<64x256xbf16>
    %c0_6 = arith.constant 0 : index
    %c0_7 = arith.constant 0 : index
    %10 = vector.load %arg4[%c0_6, %c0_7] : memref<256x128xbf16, #tpu.memory_space<vmem>>, vector<256x128xbf16>
    %cst_8 = arith.constant dense<0.000000e+00> : vector<64x128xf32>
    %11 = tpu.matmul %9, %10, %cst_8 {dimension_numbers = #tpu.dot_dimension_numbers<[1], [0], [0], [1], [0, 0, 1, 1], [], []>} : vector<64x256xbf16>, vector<256x128xbf16>, vector<64x128xf32> -> vector<64x128xf32>
    %c0_9 = arith.constant 0 : index
    %c0_10 = arith.constant 0 : index
    %12 = vector.load %arg5[%c0_9, %c0_10] : memref<1x128xf32, #tpu.memory_space<vmem>>, vector<1x128xf32>
    %13 = vector.broadcast %12 : vector<1x128xf32> to vector<64x128xf32>
    %14 = arith.addf %11, %13 : vector<64x128xf32>
    %c0_11 = arith.constant 0 : index
    %c0_12 = arith.constant 0 : index
    %15 = vector.load %arg6[%c0_11, %c0_12] : memref<64x128xf32, #tpu.memory_space<vmem>>, vector<64x128xf32>
    tpu.vector_store %arg6[%c0_11, %c0_12], %14 {strides = array<i32>} : memref<64x128xf32, #tpu.memory_space<vmem>>, vector<64x128xf32>,
    return
  }
  func.func @transform_0(%arg0: i32) -> (i32, i32) {
    %c0_i32 = arith.constant 0 : i32
    %c0_i32_0 = arith.constant 0 : i32
    return %arg0, %c0_i32 : i32, i32
  }
  func.func @transform_1(%arg0: i32) -> (i32, i32) {
    %c0_i32 = arith.constant 0 : i32
    %c0_i32_0 = arith.constant 0 : i32
    %c0_i32_1 = arith.constant 0 : i32
    return %c0_i32, %c0_i32_0 : i32, i32
  }
  func.func @transform_2(%arg0: i32) -> (i32, i32) {
    %c0_i32 = arith.constant 0 : i32
    %c0_i32_0 = arith.constant 0 : i32
    %c0_i32_1 = arith.constant 0 : i32
    return %c0_i32, %c0_i32_0 : i32, i32
  }
  func.func @transform_3(%arg0: i32) -> (i32, i32) {
    %c0_i32 = arith.constant 0 : i32
    %c0_i32_0 = arith.constant 0 : i32
    %c0_i32_1 = arith.constant 0 : i32
    return %c0_i32, %c0_i32_0 : i32, i32
  }
  func.func @transform_4(%arg0: i32) -> (i32, i32) {
    %c0_i32 = arith.constant 0 : i32
    %c0_i32_0 = arith.constant 0 : i32
    %c0_i32_1 = arith.constant 0 : i32
    return %c0_i32, %c0_i32_0 : i32, i32
  }
  func.func @transform_5(%arg0: i32) -> (i32, i32) {
    %c0_i32 = arith.constant 0 : i32
    %c0_i32_0 = arith.constant 0 : i32
    return %arg0, %c0_i32 : i32, i32
  }
}

</mosaic_0001>

<bundles_post_ra>
// kernel: tpu_custom_call.1
= control target key start
LH: loop header
LB: loop body
LE: loop exit
PB: predicated region body
PF: predicated region fallthrough
CT: control target
= control target key end

     0   :  { %10 = vsyncpa [#allocation3], 0  ;;  %s1709_s0 = inlined_call_operand.hbm [shape: f32[64,768], index: 0, kind: input, shape index: {}]   ;;  %s1710_s1 = inlined_call_operand.hbm [shape: bf16[768,256], index: 1, kind: input, shape index: {}]   ;;  %s1711_s2 = inlined_call_operand.vmem [shape: f32[1,256], index: 2, kind: input, shape index: {}]   ;;  %s1712_s3 = inlined_call_operand.hbm [shape: bf16[256,128], index: 3, kind: input, shape index: {}]   ;;  %s1713_s4 = inlined_call_operand.vmem [shape: f32[1,128], index: 4, kind: input, shape index: {}]   ;;  %s1714_s5 = inlined_call_operand.hbm [shape: f32[64,128], index: 5, kind: output, shape index: {}]  }
   0x1   :  { %11 = vsyncpa [#allocation6], 0 }
   0x2   :  { %12 = vsyncpa [#allocation4], 0  ;;  %s1601_s18 = smov [#allocation5]  }
   0x3   :  { %s30_s19 = sshll.u32 %s1601_s18, 4  ;;  %s31_s19 = int_to_ptr.vmem [resolvable:$true] %s30_s19 }
   0x4   :  { %s1523_s20 = scalar_lea.vmem %s31_s19, 12288  ;;  %p1528_p1 = scmp.lt.s32.totalorder %s31_s19, %s31_s19 }
   0x5   :  { %p1524_p0 = scmp.ne.s32.totalorder %s31_s19, %s1523_s20  ;;  %p1529_p2 = scmp.lt.s32.totalorder %s1523_s20, %s1523_s20 }
   0x7   :  { %p1530_p3 = por %p1529_p2, %p1528_p1 }
   0x9   :  { %p1531_p4 = pnand %p1530_p3, %p1524_p0 }
   0xb   :  { %1534 = shalt.err (!%p1531_p4)
}
   0xc   :  { %s1602_s21 = smov 128   ;;  %s1603_s22 = smov 8  }
   0xd   :  { %36 = dma.hbm_to_vmem [thread:$0]  %s1710_s1, 12288, %s31_s19, [#allocation6], %s1602_s21, %s1602_s21, %s1603_s22  }
   0xe   :  { %s1604_s25 = smov [#allocation2]  }
   0xf   :  { %s18_s26 = sshll.u32 %s1604_s25, 4  ;;  %s19_s26 = int_to_ptr.vmem [resolvable:$true] %s18_s26 }
  0x10   :  { %s1543_s27 = scalar_lea.vmem %s19_s26, 6144  ;;  %p1548_p6 = scmp.lt.s32.totalorder %s19_s26, %s19_s26 }
  0x11   :  { %p1544_p5 = scmp.ne.s32.totalorder %s19_s26, %s1543_s27  ;;  %p1549_p7 = scmp.lt.s32.totalorder %s1543_s27, %s1543_s27 }
  0x13   :  { %p1550_p8 = por %p1549_p7, %p1548_p6 }
  0x15   :  { %p1551_p9 = pnand %p1550_p8, %p1544_p5 }
  0x17   :  { %1554 = shalt.err (!%p1551_p9)
}
  0x18   :  { %s1605_s28 = smov 768   ;;  %s1606_s29 = smov 48  }
  0x19   :  { %24 = dma.hbm_to_vmem [thread:$0]  %s1709_s0, 6144, %s19_s26, [#allocation3], %s1605_s28, %s1605_s28, %s1606_s29  }
  0x1a   :  { %s1607_s7 = smov [#allocation7]  }
  0x1b   :  { %s44_s8 = sshll.u32 %s1607_s7, 4  ;;  %s45_s8 = int_to_ptr.vmem [resolvable:$true] %s44_s8 }
  0x1c   :  { %s1563_s1 = scalar_lea.vmem %s45_s8, 2048  ;;  %p1568_p11 = scmp.lt.s32.totalorder %s45_s8, %s45_s8 }
  0x1d   :  { %p1564_p10 = scmp.ne.s32.totalorder %s45_s8, %s1563_s1  ;;  %p1569_p12 = scmp.lt.s32.totalorder %s1563_s1, %s1563_s1 }
  0x1f   :  { %p1570_p13 = por %p1569_p12, %p1568_p11 }
  0x21   :  { %p1571_p0 = pnand %p1570_p13, %p1564_p10 }
  0x23   :  { %1574 = shalt.err (!%p1571_p0)
}
  0x24   :  { %s1608_s9 = smov 64   ;;  %s1609_s10 = smov 4  }
  0x25   :  { %50 = dma.hbm_to_vmem [thread:$0]  %s1712_s3, 2048, %s45_s8, [#allocation6], %s1608_s9, %s1608_s9, %s1609_s10  }
  0x26   :  { %1595 = dma.done.wait [#allocation3], 6144  }
  0x27   :  { %1596 = vsyncadd [#allocation3], 4294961152 }
  0x28   :  { %1597 = dma.done.wait [#allocation6], 14336  }
  0x29   :  { %1598 = vsyncadd [#allocation6], 4294952960  ;;  %v1355_v0 = vld [vmem:[#allocation5 + $0x74] ss:$8 sps:$4 sm:$0xff]   ;;  %v1357_v1 = vld [vmem:[#allocation5 + $0x70] ss:$8 sps:$4 sm:$0xff]  }
  0x2a   :  { %723 = vmatprep.subr.bf16.mxu0 %v1355_v0  ;;  %v1358_v2 = vld [vmem:[#allocation5 + $0x174] ss:$8 sps:$4 sm:$0xff]   ;;  %v1360_v3 = vld [vmem:[#allocation5 + $0x170] ss:$8 sps:$4 sm:$0xff]   ;;  %v1361_v4 = vld [vmem:[#allocation5 + $0x64] ss:$8 sps:$4 sm:$0xff]  }
  0x2b   :  { %724 = vmatpush1.bf16.msra.mxu0 %v1357_v1  ;;  %v1363_v5 = vld [vmem:[#allocation5 + $0x60] ss:$8 sps:$4 sm:$0xff]   ;;  %796 = vmatprep.subr.bf16.mxu1 %v1358_v2  ;;  %v1364_v6 = vld [vmem:[#allocation5 + $0x164] ss:$8 sps:$4 sm:$0xff]   ;;  %v1367_v8 = vld [vmem:[#allocation5 + $0x54] ss:$8 sps:$4 sm:$0xff]  }
  0x2c   :  { %797 = vmatpush1.bf16.msra.mxu1 %v1360_v3  ;;  %725 = vmatprep.subr.bf16.mxu0 %v1361_v4  ;;  %v1366_v7 = vld [vmem:[#allocation5 + $0x160] ss:$8 sps:$4 sm:$0xff]   ;;  %v1369_v9 = vld [vmem:[#allocation5 + $0x50] ss:$8 sps:$4 sm:$0xff]   ;;  %v1370_v10 = vld [vmem:[#allocation5 + $0x154] ss:$8 sps:$4 sm:$0xff]  }
  0x2d   :  { %798 = vmatprep.subr.bf16.mxu1 %v1364_v6  ;;  %v1373_v11 = vld [vmem:[#allocation5 + $0x44] ss:$8 sps:$4 sm:$0xff]   ;;  %v1372_v12 = vld [vmem:[#allocation5 + $0x150] ss:$8 sps:$4 sm:$0xff]   ;;  %v1375_v14 = vld [vmem:[#allocation5 + $0x40] ss:$8 sps:$4 sm:$0xff]  }
  0x2e   :  { %v1376_v13 = vld [vmem:[#allocation5 + $0x144] ss:$8 sps:$4 sm:$0xff]   ;;  %v1379_v15 = vld [vmem:[#allocation5 + $0x34] ss:$8 sps:$4 sm:$0xff]   ;;  %v1378_v16 = vld [vmem:[#allocation5 + $0x140] ss:$8 sps:$4 sm:$0xff]  }
  0x2f   :  { %726 = vmatpush1.bf16.msra.mxu0 %v1363_v5  ;;  %v1382_v17 = vld [vmem:[#allocation5 + $0x134] ss:$8 sps:$4 sm:$0xff]   ;;  %v1381_v18 = vld [vmem:[#allocation5 + $0x30] ss:$8 sps:$4 sm:$0xff]   ;;  %v1385_v19 = vld [vmem:[#allocation5 + $0x24] ss:$8 sps:$4 sm:$0xff]  }
  0x30   :  { %727 = vmatprep.subr.bf16.mxu0 %v1367_v8  ;;  %799 = vmatpush1.bf16.msra.mxu1 %v1366_v7  ;;  %v1384_v20 = vld [vmem:[#allocation5 + $0x130] ss:$8 sps:$4 sm:$0xff]   ;;  %v1388_v21 = vld [vmem:[#allocation5 + $0x124] ss:$8 sps:$4 sm:$0xff]   ;;  %v1387_v22 = vld [vmem:[#allocation5 + $0x20] ss:$8 sps:$4 sm:$0xff]  }
  0x31   :  { %800 = vmatprep.subr.bf16.mxu1 %v1370_v10  ;;  %v1391_v23 = vld [vmem:[#allocation5 + $0x14] ss:$8 sps:$4 sm:$0xff]   ;;  %v1390_v24 = vld [vmem:[#allocation5 + $0x120] ss:$8 sps:$4 sm:$0xff]   ;;  %v1393_v26 = vld [vmem:[#allocation5 + $0x10] ss:$8 sps:$4 sm:$0xff]  }
  0x32   :  { %v1394_v25 = vld [vmem:[#allocation5 + $0x114] ss:$8 sps:$4 sm:$0xff]   ;;  %v1397_v27 = vld [vmem:[#allocation5 + $0x4] ss:$8 sps:$4 sm:$0xff]   ;;  %v1396_v28 = vld [vmem:[#allocation5 + $0x110] ss:$8 sps:$4 sm:$0xff]  }
  0x33   :  { %728 = vmatpush1.bf16.msra.mxu0 %v1369_v9  ;;  %v1400_v29 = vld [vmem:[#allocation5 + $0x104] ss:$8 sps:$4 sm:$0xff]   ;;  %v1399_v30 = vld [vmem:[#allocation5] ss:$8 sps:$4 sm:$0xff]   ;;  %v1403_v31 = vld [vmem:[#allocation5 + $0xf4] ss:$8 sps:$4 sm:$0xff]  }
  0x34   :  { %729 = vmatprep.subr.bf16.mxu0 %v1373_v11  ;;  %801 = vmatpush1.bf16.msra.mxu1 %v1372_v12  ;;  %v1402_v32 = vld [vmem:[#allocation5 + $0x100] ss:$8 sps:$4 sm:$0xff]   ;;  %v1406_v33 = vld [vmem:[#allocation5 + $0x1f4] ss:$8 sps:$4 sm:$0xff]   ;;  %v1405_v34 = vld [vmem:[#allocation5 + $0xf0] ss:$8 sps:$4 sm:$0xff]  }
  0x35   :  { %802 = vmatprep.subr.bf16.mxu1 %v1376_v13  ;;  %v1409_v35 = vld [vmem:[#allocation5 + $0xe4] ss:$8 sps:$4 sm:$0xff]   ;;  %v1408_v36 = vld [vmem:[#allocation5 + $0x1f0] ss:$8 sps:$4 sm:$0xff]   ;;  %v1411_v38 = vld [vmem:[#allocation5 + $0xe0] ss:$8 sps:$4 sm:$0xff]  }
  0x36   :  { %v1412_v37 = vld [vmem:[#allocation5 + $0x1e4] ss:$8 sps:$4 sm:$0xff]   ;;  %v1415_v39 = vld [vmem:[#allocation5 + $0xd4] ss:$8 sps:$4 sm:$0xff]   ;;  %v1414_v40 = vld [vmem:[#allocation5 + $0x1e0] ss:$8 sps:$4 sm:$0xff]  }
  0x37   :  { %730 = vmatpush1.bf16.msra.mxu0 %v1375_v14  ;;  %v1418_v41 = vld [vmem:[#allocation5 + $0x1d4] ss:$8 sps:$4 sm:$0xff]   ;;  %v1417_v42 = vld [vmem:[#allocation5 + $0xd0] ss:$8 sps:$4 sm:$0xff]   ;;  %v1421_v43 = vld [vmem:[#allocation5 + $0xc4] ss:$8 sps:$4 sm:$0xff]  }
  0x38   :  { %731 = vmatprep.subr.bf16.mxu0 %v1379_v15  ;;  %803 = vmatpush1.bf16.msra.mxu1 %v1378_v16  ;;  %v1420_v44 = vld [vmem:[#allocation5 + $0x1d0] ss:$8 sps:$4 sm:$0xff]   ;;  %v1424_v45 = vld [vmem:[#allocation5 + $0x1c4] ss:$8 sps:$4 sm:$0xff]   ;;  %v1423_v48 = vld [vmem:[#allocation5 + $0xc0] ss:$8 sps:$4 sm:$0xff]  }
  0x39   :  { %804 = vmatprep.subr.bf16.mxu1 %v1382_v17  ;;  %v64_v46 = vld [vmem:[#allocation2 + $0x8] sm:$0xff]  ;;  %v70_v47 = vld [vmem:[#allocation2 + $0x38] sm:$0xff]  ;;  %v63_v5 = vld [vmem:[#allocation2] sm:$0xff] }
  0x3a   :  { %v112_v49 = vpack.c.bf16 %v70_v47, %v64_v46  ;;  %v1427_v50 = vld [vmem:[#allocation5 + $0xb4] ss:$8 sps:$4 sm:$0xff]   ;;  %v1426_v51 = vld [vmem:[#allocation5 + $0x1c0] ss:$8 sps:$4 sm:$0xff]   ;;  %v1429_v56 = vld [vmem:[#allocation5 + $0xb0] ss:$8 sps:$4 sm:$0xff]  }
  0x3b   :  { %732 = vmatpush1.bf16.msra.mxu0 %v1381_v18  ;;  %v66_v52 = vld [vmem:[#allocation2 + $0x18] sm:$0xff]  ;;  %v72_v53 = vld [vmem:[#allocation2 + $0x48] sm:$0xff]  ;;  %v69_v6 = vld [vmem:[#allocation2 + $0x30] sm:$0xff] }
  0x3c   :  { %733 = vmatprep.subr.bf16.mxu0 %v1385_v19  ;;  %805 = vmatpush1.bf16.msra.mxu1 %v1384_v20  ;;  %v1430_v54 = vld [vmem:[#allocation5 + $0x1b4] ss:$8 sps:$4 sm:$0xff]   ;;  %v114_v55 = vpack.c.bf16 %v72_v53, %v66_v52  ;;  %v1433_v57 = vld [vmem:[#allocation5 + $0xa4] ss:$8 sps:$4 sm:$0xff]   ;;  %v1432_v58 = vld [vmem:[#allocation5 + $0x1b0] ss:$8 sps:$4 sm:$0xff]   ;;  %v111_v13 = vpack.c.bf16 %v69_v6, %v63_v5 }
  0x3d   :  { %806 = vmatprep.subr.bf16.mxu1 %v1388_v21  ;;  %755 = vmatprep.mubr.bf16.mxu0 %v112_v49  ;;  %v1436_v59 = vld [vmem:[#allocation5 + $0x1a4] ss:$8 sps:$4 sm:$0xff]   ;;  %v1435_v60 = vld [vmem:[#allocation5 + $0xa0] ss:$8 sps:$4 sm:$0xff]   ;;  %v1439_v61 = vld [vmem:[#allocation5 + $0x94] ss:$8 sps:$4 sm:$0xff]  }
  0x3e   :  { %828 = vmatprep.mubr.bf16.mxu1 %v114_v55  ;;  %v1438_v62 = vld [vmem:[#allocation5 + $0x1a0] ss:$8 sps:$4 sm:$0xff]   ;;  %v1442_v63 = vld [vmem:[#allocation5 + $0x194] ss:$8 sps:$4 sm:$0xff]   ;;  %v1441_v0 = vld [vmem:[#allocation5 + $0x90] ss:$8 sps:$4 sm:$0xff]  }
  0x3f   :  { %734 = vmatpush1.bf16.msra.mxu0 %v1387_v22  ;;  %v1445_v1 = vld [vmem:[#allocation5 + $0x84] ss:$8 sps:$4 sm:$0xff]   ;;  %v1444_v2 = vld [vmem:[#allocation5 + $0x190] ss:$8 sps:$4 sm:$0xff]   ;;  %v1447_v3 = vld [vmem:[#allocation5 + $0x80] ss:$8 sps:$4 sm:$0xff]  }
  0x40   :  { %735 = vmatprep.subr.bf16.mxu0 %v1391_v23  ;;  %807 = vmatpush1.bf16.msra.mxu1 %v1390_v24  ;;  %v1448_v4 = vld [vmem:[#allocation5 + $0x184] ss:$8 sps:$4 sm:$0xff]   ;;  %v1450_v7 = vld [vmem:[#allocation5 + $0x180] ss:$8 sps:$4 sm:$0xff]   ;;  %v1453_v8 = vld [vmem:[#allocation5 + $0x274] ss:$8 sps:$4 sm:$0xff]  }
  0x41   :  { %808 = vmatprep.subr.bf16.mxu1 %v1394_v25  ;;  %v65_v9 = vld [vmem:[#allocation2 + $0x10] sm:$0xff]  ;;  %v76_v10 = vld [vmem:[#allocation2 + $0x68] sm:$0xff]  ;;  %v82_v11 = vld [vmem:[#allocation2 + $0x98] sm:$0xff] }
  0x42   :  { %v71_v12 = vld [vmem:[#allocation2 + $0x40] sm:$0xff]  ;;  %v78_v14 = vld [vmem:[#allocation2 + $0x78] sm:$0xff]  ;;  %v84_v15 = vld [vmem:[#allocation2 + $0xa8] sm:$0xff]  ;;  %v118_v17 = vpack.c.bf16 %v82_v11, %v76_v10 }
  0x43   :  { %736 = vmatpush1.bf16.msra.mxu0 %v1393_v26  ;;  %v1451_v16 = vld [vmem:[#allocation5 + $0x270] ss:$8 sps:$4 sm:$0xff]   ;;  %v113_v18 = vpack.c.bf16 %v71_v12, %v65_v9  ;;  %v1456_v19 = vld [vmem:[#allocation5 + $0x264] ss:$8 sps:$4 sm:$0xff]   ;;  %v120_v20 = vpack.c.bf16 %v84_v15, %v78_v14  ;;  %v1454_v21 = vld [vmem:[#allocation5 + $0x260] ss:$8 sps:$4 sm:$0xff]  }
  0x44   :  { %737 = vmatprep.subr.bf16.mxu0 %v1397_v27  ;;  %809 = vmatpush1.bf16.msra.mxu1 %v1396_v28  ;;  %v75_v22 = vld [vmem:[#allocation2 + $0x60] sm:$0xff]  ;;  %v81_v23 = vld [vmem:[#allocation2 + $0x90] sm:$0xff]  ;;  %v88_v25 = vld [vmem:[#allocation2 + $0xc8] sm:$0xff] }
  0x45   :  { %810 = vmatprep.subr.bf16.mxu1 %v1400_v29  ;;  %v1459_v24 = vld [vmem:[#allocation5 + $0x254] ss:$8 sps:$4 sm:$0xff]   ;;  %v83_v28 = vld [vmem:[#allocation2 + $0xa0] sm:$0xff]  ;;  %v117_v29 = vpack.c.bf16 %v81_v23, %v75_v22  ;;  %v108_v47 = vld [vmem:[#allocation2 + $0x168] sm:$0xff] }
  0x46   :  { %v94_v26 = vld [vmem:[#allocation2 + $0xf8] sm:$0xff]  ;;  %v77_v27 = vld [vmem:[#allocation2 + $0x70] sm:$0xff]  ;;  %v1466_v52 = vld [vmem:[#allocation5 + $0x220] ss:$8 sps:$4 sm:$0xff]  }
  0x47   :  { %738 = vmatpush1.bf16.msra.mxu0 %v1399_v30  ;;  %v90_v30 = vld [vmem:[#allocation2 + $0xd8] sm:$0xff]  ;;  %v99_v53 = vld [vmem:[#allocation2 + $0x120] sm:$0xff] }
  0x48   :  { %739 = vmatprep.subr.bf16.mxu0 %v1403_v31  ;;  %811 = vmatpush1.bf16.msra.mxu1 %v1402_v32  ;;  %v96_v31 = vld [vmem:[#allocation2 + $0x108] sm:$0xff]  ;;  %v1457_v32 = vld [vmem:[#allocation5 + $0x250] ss:$8 sps:$4 sm:$0xff]   ;;  %v1489_v11 = vld [vmem:[#allocation5 + $0x2b4] ss:$8 sps:$4 sm:$0xff]  }
  0x49   :  { %812 = vmatprep.subr.bf16.mxu1 %v1406_v33  ;;  %v124_v33 = vpack.c.bf16 %v94_v26, %v88_v25  ;;  %v102_v46 = vld [vmem:[#allocation2 + $0x138] sm:$0xff]  ;;  %v1480_v5 = vld [vmem:[#allocation5 + $0x2e4] ss:$8 sps:$4 sm:$0xff]   ;;  %v1478_v6 = vld [vmem:[#allocation5 + $0x2e0] ss:$8 sps:$4 sm:$0xff]  }
  0x4a   :  { %v132_v55 = vpack.c.bf16 %v108_v47, %v102_v46  ;;  %v1486_v9 = vld [vmem:[#allocation5 + $0x2c4] ss:$8 sps:$4 sm:$0xff]   ;;  %v1484_v10 = vld [vmem:[#allocation5 + $0x2c0] ss:$8 sps:$4 sm:$0xff]   ;;  %v1487_v12 = vld [vmem:[#allocation5 + $0x2b0] ss:$8 sps:$4 sm:$0xff]  }
  0x4b   :  { %740 = vmatpush2.bf16.msra.mxu0 %v1405_v34  ;;  %v1462_v34 = vld [vmem:[#allocation5 + $0x244] ss:$8 sps:$4 sm:$0xff]   ;;  %v1490_v14 = vld [vmem:[#allocation5 + $0x2a0] ss:$8 sps:$4 sm:$0xff]   ;;  %v1495_v15 = vld [vmem:[#allocation5 + $0x294] ss:$8 sps:$4 sm:$0xff]  }
  0x4c   :  { %741 = vmatprep.subr.bf16.mxu0 %v1409_v35  ;;  %813 = vmatpush2.bf16.msra.mxu1 %v1408_v36  ;;  %v119_v35 = vpack.c.bf16 %v83_v28, %v77_v27  ;;  %v126_v36 = vpack.c.bf16 %v96_v31, %v90_v30  ;;  %v86_v22 = vld [vmem:[#allocation2 + $0xb8] sm:$0xff]  ;;  %v79_v25 = vld [vmem:[#allocation2 + $0x80] sm:$0xff]  ;;  %v85_v26 = vld [vmem:[#allocation2 + $0xb0] sm:$0xff] }
  0x4d   :  { %814 = vmatprep.subr.bf16.mxu1 %v1412_v37  ;;  %v1460_v37 = vld [vmem:[#allocation5 + $0x240] ss:$8 sps:$4 sm:$0xff]   ;;  %v98_v28 = vld [vmem:[#allocation2 + $0x118] sm:$0xff] }
  0x4e   :  { %v92_v27 = vld [vmem:[#allocation2 + $0xe8] sm:$0xff]  ;;  %v91_v31 = vld [vmem:[#allocation2 + $0xe0] sm:$0xff] }
  0x4f   :  { %742 = vmatpush2.bf16.msra.mxu0 %v1411_v38  ;;  %v87_v38 = vld [vmem:[#allocation2 + $0xc0] sm:$0xff]  ;;  %v128_v30 = vpack.c.bf16 %v98_v28, %v92_v27 }
  0x50   :  { %743 = vmatprep.subr.bf16.mxu0 %v1415_v39  ;;  %815 = vmatpush2.bf16.msra.mxu1 %v1414_v40  ;;  %v93_v39 = vld [vmem:[#allocation2 + $0xf0] sm:$0xff]  ;;  %v1505_v46 = vld [vmem:[#allocation7 + $0x60] sm:$0xff]  }
  0x51   :  { %816 = vmatprep.subr.bf16.mxu1 %v1418_v41  ;;  %v1465_v40 = vld [vmem:[#allocation5 + $0x234] ss:$8 sps:$4 sm:$0xff]   ;;  %v100_v41 = vld [vmem:[#allocation2 + $0x128] sm:$0xff]  ;;  %v1506_v47 = vld [vmem:[#allocation7 + $0x20] sm:$0xff]  }
  0x53   :  { %744 = vmatpush2.bf16.msra.mxu0 %v1417_v42  ;;  %v106_v42 = vld [vmem:[#allocation2 + $0x158] sm:$0xff] }
  0x54   :  { %745 = vmatprep.subr.bf16.mxu0 %v1421_v43  ;;  %817 = vmatpush2.bf16.msra.mxu1 %v1420_v44  ;;  %v89_v43 = vld [vmem:[#allocation2 + $0xd0] sm:$0xff]  ;;  %v95_v44 = vld [vmem:[#allocation2 + $0x100] sm:$0xff]  ;;  %v130_v49 = vpack.c.bf16 %v106_v42, %v100_v41  ;;  %v1500_v41 = vld [vmem:[#allocation7 + $0x38] sm:$0xff]  }
  0x55   :  { %818 = vmatprep.subr.bf16.mxu1 %v1424_v45  ;;  %v123_v45 = vpack.c.bf16 %v93_v39, %v87_v38  ;;  %v109_v38 = vld [vmem:[#allocation2 + $0x170] sm:$0xff]  ;;  %v1499_v39 = vld [vmem:[#allocation7 + $0x78] sm:$0xff]  }
  0x56   :  { %v1501_v42 = vld [vmem:[#allocation7 + $0x70] sm:$0xff]  }
  0x57   :  { %746 = vmatpush2.bf16.msra.mxu0 %v1423_v48  ;;  %v1463_v48 = vld [vmem:[#allocation5 + $0x230] ss:$8 sps:$4 sm:$0xff]  }
  0x58   :  { %747 = vmatprep.subr.bf16.mxu0 %v1427_v50  ;;  %819 = vmatpush2.bf16.msra.mxu1 %v1426_v51  ;;  %v1468_v50 = vld [vmem:[#allocation5 + $0x224] ss:$8 sps:$4 sm:$0xff]   ;;  %v125_v51 = vpack.c.bf16 %v95_v44, %v89_v43  ;;  %v1502_v43 = vld [vmem:[#allocation7 + $0x30] sm:$0xff]  }
  0x59   :  { %820 = vmatprep.subr.bf16.mxu1 %v1430_v54  ;;  %v105_v54 = vld [vmem:[#allocation2 + $0x150] sm:$0xff]  ;;  %v1503_v44 = vld [vmem:[#allocation7 + $0x68] sm:$0xff]  }
  0x5b   :  { %748 = vmatpush2.bf16.msra.mxu0 %v1429_v56  ;;  %v1471_v56 = vld [vmem:[#allocation5 + $0x214] ss:$8 sps:$4 sm:$0xff]  }
  0x5c   :  { %749 = vmatprep.subr.bf16.mxu0 %v1433_v57  ;;  %821 = vmatpush2.bf16.msra.mxu1 %v1432_v58  ;;  %v68_v57 = vld [vmem:[#allocation2 + $0x28] sm:$0xff]  ;;  %v74_v58 = vld [vmem:[#allocation2 + $0x58] sm:$0xff] }
  0x5d   :  { %822 = vmatprep.subr.bf16.mxu1 %v1436_v59  ;;  %v101_v59 = vld [vmem:[#allocation2 + $0x130] sm:$0xff] }
  0x5f   :  { %750 = vmatpush2.bf16.msra.mxu0 %v1435_v60  ;;  %v107_v60 = vld [vmem:[#allocation2 + $0x160] sm:$0xff] }
  0x60   :  { %751 = vmatprep.subr.bf16.mxu0 %v1439_v61  ;;  %823 = vmatpush2.bf16.msra.mxu1 %v1438_v62  ;;  %v1469_v61 = vld [vmem:[#allocation5 + $0x210] ss:$8 sps:$4 sm:$0xff]   ;;  %v1474_v62 = vld [vmem:[#allocation5 + $0x204] ss:$8 sps:$4 sm:$0xff]  }
  0x61   :  { %824 = vmatprep.subr.bf16.mxu1 %v1442_v63  ;;  %v129_v63 = vpack.c.bf16 %v105_v54, %v99_v53  ;;  %v1512_v53 = vld [vmem:[#allocation7 + $0x8] sm:$0xff]   ;;  %v1513_v54 = vld [vmem:[#allocation7 + $0x40] sm:$0xff]  }
  0x63   :  { %752 = vmatpush2.bf16.msra.mxu0 %v1441_v0  ;;  %v116_v0 = vpack.c.bf16 %v74_v58, %v68_v57 }
  0x64   :  { %753 = vmatprep.subr.bf16.mxu0 %v1445_v1  ;;  %825 = vmatpush2.bf16.msra.mxu1 %v1444_v2  ;;  %v131_v1 = vpack.c.bf16 %v107_v60, %v101_v59  ;;  %v1472_v2 = vld [vmem:[#allocation5 + $0x200] ss:$8 sps:$4 sm:$0xff]  }
  0x65   :  { %826 = vmatprep.subr.bf16.mxu1 %v1448_v4  ;;  %v1475_v4 = vld [vmem:[#allocation5 + $0x2f0] ss:$8 sps:$4 sm:$0xff]  }
  0x67   :  { %754 = vmatpush2.bf16.msra.mxu0 %v1447_v3  ;;  %v1477_v3 = vld [vmem:[#allocation5 + $0x2f4] ss:$8 sps:$4 sm:$0xff]  }
  0x68   :  { %869 = vmatprep.subr.bf16.mxu0 %v1453_v8  ;;  %827 = vmatpush2.bf16.msra.mxu1 %v1450_v7  ;;  %v1483_v7 = vld [vmem:[#allocation5 + $0x2d4] ss:$8 sps:$4 sm:$0xff]   ;;  %v1481_v8 = vld [vmem:[#allocation5 + $0x2d0] ss:$8 sps:$4 sm:$0xff]  }
  0x69   :  { %1305 = vmatprep.subr.bf16.mxu1 %v1499_v39 }
  0x6a   :  { %756 = vmatmul.mubr.bf16.vlgmr.msra.gmra.mxu0 %v111_v13  ;;  %v1492_v13 = vld [vmem:[#allocation5 + $0x2a4] ss:$8 sps:$4 sm:$0xff]  }
  0x6b   :  { %870 = vmatpush1.bf16.msra.mxu0 %v1451_v16  ;;  %765 = vmatprep.mubr.bf16.mxu0 %v118_v17  ;;  %v1493_v16 = vld [vmem:[#allocation5 + $0x290] ss:$8 sps:$4 sm:$0xff]   ;;  %v1498_v17 = vld [vmem:[#allocation5 + $0x284] ss:$8 sps:$4 sm:$0xff]  }
  0x6c   :  { %829 = vmatmul.mubr.bf16.vlgmr.msra.gmra.mxu1 %v113_v18  ;;  %871 = vmatprep.subr.bf16.mxu0 %v1456_v19  ;;  %v1496_v18 = vld [vmem:[#allocation5 + $0x280] ss:$8 sps:$4 sm:$0xff]  }
  0x6d   :  { %838 = vmatprep.mubr.bf16.mxu1 %v120_v20  ;;  %v67_v19 = vld [vmem:[#allocation2 + $0x20] sm:$0xff]  ;;  %v73_v20 = vld [vmem:[#allocation2 + $0x50] sm:$0xff]  ;;  %1306 = vmatpush3.bf16.msra.mxu1 %v1500_v41 }
  0x6e   :  { %v115_v23 = vpack.c.bf16 %v73_v20, %v67_v19  ;;  %1307 = vmatprep.subr.bf16.mxu1 %v1501_v42 }
  0x6f   :  { %872 = vmatpush1.bf16.msra.mxu0 %v1454_v21  ;;  %v80_v21 = vld [vmem:[#allocation2 + $0x88] sm:$0xff] }
  0x70   :  { %873 = vmatprep.subr.bf16.mxu0 %v1459_v24  ;;  %v122_v24 = vpack.c.bf16 %v86_v22, %v80_v21 }
  0x71   :  { %1308 = vmatpush3.bf16.msra.mxu1 %v1502_v43 }
  0x72   :  { %766 = vmatmul.mubr.bf16.gmra.mxu0 %v117_v29  ;;  %v121_v29 = vpack.c.bf16 %v85_v26, %v79_v25  ;;  %1309 = vmatprep.subr.bf16.mxu1 %v1503_v44 }
  0x73   :  { %874 = vmatpush1.bf16.msra.mxu0 %v1457_v32  ;;  %775 = vmatprep.mubr.bf16.mxu0 %v124_v33  ;;  %v97_v32 = vld [vmem:[#allocation2 + $0x110] sm:$0xff]  ;;  %v104_v33 = vld [vmem:[#allocation2 + $0x148] sm:$0xff] }
  0x74   :  { %875 = vmatprep.subr.bf16.mxu0 %v1462_v34  ;;  %839 = vmatmul.mubr.bf16.gmra.mxu1 %v119_v35  ;;  %v110_v34 = vld [vmem:[#allocation2 + $0x178] sm:$0xff]  ;;  %v127_v35 = vpack.c.bf16 %v97_v32, %v91_v31 }
  0x75   :  { %848 = vmatprep.mubr.bf16.mxu1 %v126_v36  ;;  %v134_v36 = vpack.c.bf16 %v110_v34, %v104_v33 }
  0x77   :  { %876 = vmatpush1.bf16.msra.mxu0 %v1460_v37  ;;  %v103_v37 = vld [vmem:[#allocation2 + $0x140] sm:$0xff] }
  0x78   :  { %877 = vmatprep.subr.bf16.mxu0 %v1465_v40  ;;  %v133_v40 = vpack.c.bf16 %v109_v38, %v103_v37 }
  0x7a   :  { %776 = vmatmul.mubr.bf16.gmra.mxu0 %v123_v45  ;;  %v1504_v45 = vld [vmem:[#allocation7 + $0x28] sm:$0xff]  }
  0x7b   :  { %878 = vmatpush1.bf16.msra.mxu0 %v1463_v48  ;;  %785 = vmatprep.mubr.bf16.mxu0 %v130_v49  ;;  %v1507_v48 = vld [vmem:[#allocation7 + $0x58] sm:$0xff]  }
  0x7c   :  { %879 = vmatprep.subr.bf16.mxu0 %v1468_v50  ;;  %849 = vmatmul.mubr.bf16.gmra.mxu1 %v125_v51  ;;  %v1508_v49 = vld [vmem:[#allocation7 + $0x18] sm:$0xff]   ;;  %v1509_v50 = vld [vmem:[#allocation7 + $0x50] sm:$0xff]  }
  0x7d   :  { %858 = vmatprep.mubr.bf16.mxu1 %v132_v55  ;;  %1310 = vmatpush3.bf16.msra.mxu1 %v1504_v45  ;;  %v1510_v51 = vld [vmem:[#allocation7 + $0x10] sm:$0xff]   ;;  %v1514_v55 = vld [vmem:[#allocation7] sm:$0xff]  }
  0x7e   :  { %1311 = vmatprep.subr.bf16.mxu1 %v1505_v46 }
  0x7f   :  { %880 = vmatpush1.bf16.msra.mxu0 %v1466_v52  ;;  %v1511_v52 = vld [vmem:[#allocation7 + $0x48] sm:$0xff]  }
  0x80   :  { %881 = vmatprep.subr.bf16.mxu0 %v1471_v56 }
  0x81   :  { %1312 = vmatpush3.bf16.msra.mxu1 %v1506_v47 }
  0x82   :  { %786 = vmatmul.mubr.bf16.gmra.mxu0 %v129_v63  ;;  %1313 = vmatprep.subr.bf16.mxu1 %v1507_v48 }
  0x83   :  { %882 = vmatpush1.bf16.msra.mxu0 %v1469_v61  ;;  %901 = vmatprep.mubr.bf16.mxu0 %v116_v0 }
  0x84   :  { %883 = vmatprep.subr.bf16.mxu0 %v1474_v62  ;;  %859 = vmatmul.mubr.bf16.gmra.mxu1 %v131_v1 }
  0x85   :  { %1314 = vmatpush3.bf16.msra.mxu1 %v1508_v49 }
  0x86   :  { %1315 = vmatprep.subr.bf16.mxu1 %v1509_v50 }
  0x87   :  { %884 = vmatpush1.bf16.msra.mxu0 %v1472_v2 }
  0x88   :  { %885 = vmatprep.subr.bf16.mxu0 %v1477_v3 }
  0x89   :  { %1316 = vmatpush3.bf16.msra.mxu1 %v1510_v51 }
  0x8a   :  { %1317 = vmatprep.subr.bf16.mxu1 %v1511_v52 }
  0x8b   :  { %886 = vmatpush2.bf16.msra.mxu0 %v1475_v4 }
  0x8c   :  { %887 = vmatprep.subr.bf16.mxu0 %v1480_v5 }
  0x8d   :  { %1318 = vmatpush3.bf16.msra.mxu1 %v1512_v53 }
  0x8e   :  { %1319 = vmatprep.subr.bf16.mxu1 %v1513_v54 }
  0x8f   :  { %888 = vmatpush2.bf16.msra.mxu0 %v1478_v6 }
  0x90   :  { %889 = vmatprep.subr.bf16.mxu0 %v1483_v7 }
  0x91   :  { %1320 = vmatpush3.bf16.msra.mxu1 %v1514_v55 }
  0x93   :  { %890 = vmatpush2.bf16.msra.mxu0 %v1481_v8 }
  0x94   :  { %891 = vmatprep.subr.bf16.mxu0 %v1486_v9  ;;  %v233_v9 = vlaneseq }
  0x97   :  { %892 = vmatpush2.bf16.msra.mxu0 %v1484_v10 }
  0x98   :  { %893 = vmatprep.subr.bf16.mxu0 %v1489_v11 }
  0x9b   :  { %894 = vmatpush2.bf16.msra.mxu0 %v1487_v12  ;;  %v234_v12 = vshrl.u32 %v233_v9, 7 }
  0x9c   :  { %895 = vmatprep.subr.bf16.mxu0 %v1492_v13 }
  0x9f   :  { %896 = vmatpush2.bf16.msra.mxu0 %v1490_v14 }
  0xa0   :  { %897 = vmatprep.subr.bf16.mxu0 %v1495_v15  ;;  %v239_v15 = vsub.s32 1, %v234_v12 }
  0xa3   :  { %898 = vmatpush2.bf16.msra.mxu0 %v1493_v16  ;;  %v231_v16 = vld [vmem:[%s1711_s2] sm:$0x3] }
  0xa4   :  { %899 = vmatprep.subr.bf16.mxu0 %v1498_v17  ;;  %v235_v17 = vsub.s32 0, %v234_v12  ;;  %v1670_v20 = vrot.slane %v231_v16, %v239_v15 }
  0xa6   :  { %v1672_v21 = vrot.slane %v231_v16, %v235_v17 }
  0xa7   :  { %900 = vmatpush2.bf16.msra.mxu0 %v1496_v18 }
  0xaa   :  { %902 = vmatmul.mubr.bf16.vlgmr.msra.gmra.mxu0 %v115_v23 }
  0xab   :  { %911 = vmatprep.mubr.bf16.mxu0 %v122_v24 }
  0xb2   :  { %912 = vmatmul.mubr.bf16.gmra.mxu0 %v121_v29 }
  0xb3   :  { %921 = vmatprep.mubr.bf16.mxu0 %v128_v30 }
  0xba   :  { %922 = vmatmul.mubr.bf16.gmra.mxu0 %v127_v35 }
  0xbb   :  { %931 = vmatprep.mubr.bf16.mxu0 %v134_v36 }
  0xc2   :  { %932 = vmatmul.mubr.bf16.gmra.mxu0 %v133_v40 }
 0x12a   :  { %v757_v56 = vpop.f32.mrf.mxu0 }
 0x12b   :  { %v758_v26 = vadd.f32 %v757_v56, %v1672_v21 }
 0x12c   :  { %v759_v57 = vpop.f32.mrf.mxu0  ;;  %v830_v0 = vpop.f32.mrf.mxu1 }
 0x12d   :  { %v760_v24 = vadd.f32 %v759_v57, %v1670_v20  ;;  %v831_v33 = vadd.f32 %v830_v0, %v758_v26 }
 0x12e   :  { %v761_v58 = vpop.f32.mrf.mxu0  ;;  %v832_v2 = vpop.f32.mrf.mxu1 }
 0x12f   :  { %v762_v25 = vadd.f32 %v761_v58, %v1672_v21  ;;  %v833_v31 = vadd.f32 %v832_v2, %v760_v24 }
 0x130   :  { %v763_v59 = vpop.f32.mrf.mxu0  ;;  %v834_v4 = vpop.f32.mrf.mxu1 }
 0x131   :  { %v764_v28 = vadd.f32 %v763_v59, %v1670_v20  ;;  %v835_v32 = vadd.f32 %v834_v4, %v762_v25 }
 0x132   :  { %v767_v60 = vpop.f32.mrf.mxu0  ;;  %v836_v6 = vpop.f32.mrf.mxu1 }
 0x133   :  { %v837_v35 = vadd.f32 %v836_v6, %v764_v28  ;;  %v768_v44 = vadd.f32 %v767_v60, %v1672_v21 }
 0x134   :  { %v769_v61 = vpop.f32.mrf.mxu0  ;;  %v840_v7 = vpop.f32.mrf.mxu1 }
 0x135   :  { %v770_v41 = vadd.f32 %v769_v61, %v1670_v20  ;;  %v841_v56 = vadd.f32 %v840_v7, %v768_v44 }
 0x136   :  { %v771_v62 = vpop.f32.mrf.mxu0  ;;  %v842_v10 = vpop.f32.mrf.mxu1 }
 0x137   :  { %v772_v42 = vadd.f32 %v771_v62, %v1672_v21  ;;  %v843_v53 = vadd.f32 %v842_v10, %v770_v41 }
 0x138   :  { %v773_v63 = vpop.f32.mrf.mxu0  ;;  %v844_v13 = vpop.f32.mrf.mxu1 }
 0x139   :  { %v774_v47 = vadd.f32 %v773_v63, %v1670_v20  ;;  %v845_v54 = vadd.f32 %v844_v13, %v772_v42 }
 0x13a   :  { %v1653_v1 = vpop.f32.mrf.mxu0  ;;  %v846_v18 = vpop.f32.mrf.mxu1 }
 0x13b   :  { %v847_v59 = vadd.f32 %v846_v18, %v774_v47  ;;  %v778_v7 = vadd.f32 %v1653_v1, %v1672_v21 }
 0x13c   :  { %v1655_v3 = vpop.f32.mrf.mxu0  ;;  %v850_v22 = vpop.f32.mrf.mxu1 }
 0x13d   :  { %v780_v63 = vadd.f32 %v1655_v3, %v1670_v20  ;;  %v851_v26 = vadd.f32 %v850_v22, %v778_v7 }
 0x13e   :  { %v1657_v5 = vpop.f32.mrf.mxu0  ;;  %v852_v29 = vpop.f32.mrf.mxu1 }
 0x13f   :  { %v782_v4 = vadd.f32 %v1657_v5, %v1672_v21  ;;  %v853_v24 = vadd.f32 %v852_v29, %v780_v63 }
 0x140   :  { %v1659_v8 = vpop.f32.mrf.mxu0  ;;  %v854_v38 = vpop.f32.mrf.mxu1 }
 0x141   :  { %v784_v12 = vadd.f32 %v1659_v8, %v1670_v20  ;;  %v855_v25 = vadd.f32 %v854_v38, %v782_v4 }
 0x142   :  { %v1661_v11 = vpop.f32.mrf.mxu0  ;;  %v856_v50 = vpop.f32.mrf.mxu1 }
 0x143   :  { %v857_v28 = vadd.f32 %v856_v50, %v784_v12  ;;  %v788_v22 = vadd.f32 %v1661_v11, %v1672_v21 }
 0x144   :  { %v1663_v14 = vpop.f32.mrf.mxu0  ;;  %v860_v60 = vpop.f32.mrf.mxu1 }
 0x145   :  { %v790_v8 = vadd.f32 %v1663_v14, %v1670_v20 }
 0x146   :  { %v1668_v19 = vpop.f32.mrf.mxu0  ;;  %v862_v16 = vpop.f32.mrf.mxu1 }
 0x148   :  { %v1674_v23 = vpop.f32.mrf.mxu0  ;;  %v864_v1 = vpop.f32.mrf.mxu1 }
 0x16a   :  { %v903_v27 = vpop.f32.mrf.mxu0 }
 0x16b   :  { %v904_v39 = vadd.f32 %v903_v27, %v831_v33 }
 0x16c   :  { %v905_v30 = vpop.f32.mrf.mxu0 }
 0x16d   :  { %v906_v36 = vadd.f32 %v905_v30, %v833_v31  ;;  %v942_v51 = vmax.f32 %v904_v39, 0.0 }
 0x16e   :  { %v907_v34 = vpop.f32.mrf.mxu0 }
 0x16f   :  { %v908_v37 = vadd.f32 %v907_v34, %v835_v32  ;;  %v943_v48 = vmax.f32 %v906_v36, 0.0  ;;  %v792_v34 = vadd.f32 %v1668_v19, %v1672_v21 }
 0x170   :  { %v909_v40 = vpop.f32.mrf.mxu0 }
 0x171   :  { %v910_v43 = vadd.f32 %v909_v40, %v837_v35  ;;  %v944_v45 = vmax.f32 %v908_v37, 0.0  ;;  %v794_v37 = vadd.f32 %v1674_v23, %v1670_v20  ;;  %v866_v40 = vpop.f32.mrf.mxu1  ;;  %v865_v44 = vadd.f32 %v864_v1, %v792_v34 }
 0x172   :  { %v913_v46 = vpop.f32.mrf.mxu0 }
 0x173   :  { %v945_v49 = vmax.f32 %v910_v43, 0.0  ;;  %v958_v57 = vpack.c.bf16 %v944_v45, %v942_v51  ;;  %v914_v0 = vadd.f32 %v913_v46, %v841_v56  ;;  %v863_v43 = vadd.f32 %v862_v16, %v790_v8  ;;  %v1288_v56 = vld [vmem:[%s1713_s4] ss:$0 sm:$0xff]  ;;  %s1610_s4 = smov [#allocation8]  }
 0x174   :  { %v915_v52 = vpop.f32.mrf.mxu0  ;;  %v861_v45 = vadd.f32 %v860_v60, %v788_v22  ;;  %v867_v47 = vadd.f32 %v866_v40, %v794_v37  ;;  %s1179_s14 = sshll.u32 %s1610_s4, 4  ;;  %s1180_s14 = int_to_ptr.vmem [resolvable:$true] %s1179_s14 }
 0x175   :  { %v959_v55 = vpack.c.bf16 %v945_v49, %v943_v48  ;;  %v916_v61 = vadd.f32 %v915_v52, %v843_v53  ;;  %v946_v17 = vmax.f32 %v914_v0, 0.0  ;;  %s1575_s15 = scalar_lea.vmem %s1180_s14, 1024  ;;  %p1580_p2 = scmp.lt.s32.totalorder %s1180_s14, %s1180_s14 }
 0x176   :  { %v917_v58 = vpop.f32.mrf.mxu0  ;;  %p1576_p1 = scmp.ne.s32.totalorder %s1180_s14, %s1575_s15  ;;  %p1581_p3 = scmp.lt.s32.totalorder %s1575_s15, %s1575_s15 }
 0x177   :  { %v918_v62 = vadd.f32 %v917_v58, %v845_v54  ;;  %1133 = vmatprep.mubr.bf16.mxu1 %v959_v55  ;;  %v947_v13 = vmax.f32 %v916_v61, 0.0 }
 0x178   :  { %v919_v2 = vpop.f32.mrf.mxu0  ;;  %1134 = vmatmul.mubr.bf16.vlgmr.msra.gmra.mxu1 %v958_v57  ;;  %p1582_p4 = por %p1581_p3, %p1580_p2 }
 0x179   :  { %v920_v6 = vadd.f32 %v919_v2, %v847_v59  ;;  %v948_v9 = vmax.f32 %v918_v62, 0.0 }
 0x17a   :  { %v923_v10 = vpop.f32.mrf.mxu0  ;;  %p1583_p5 = pnand %p1582_p4, %p1576_p1 }
 0x17b   :  { %v949_v15 = vmax.f32 %v920_v6, 0.0  ;;  %v960_v27 = vpack.c.bf16 %v948_v9, %v946_v17  ;;  %v924_v32 = vadd.f32 %v923_v10, %v851_v26 }
 0x17c   :  { %v925_v18 = vpop.f32.mrf.mxu0 }
 0x17d   :  { %v961_v3 = vpack.c.bf16 %v949_v15, %v947_v13  ;;  %v926_v30 = vadd.f32 %v925_v18, %v853_v24  ;;  %v950_v41 = vmax.f32 %v924_v32, 0.0 }
 0x17e   :  { %v927_v5 = vpop.f32.mrf.mxu0 }
 0x17f   :  { %v928_v31 = vadd.f32 %v927_v5, %v855_v25  ;;  %1141 = vmatprep.mubr.bf16.mxu1 %v961_v3  ;;  %v951_v38 = vmax.f32 %v926_v30, 0.0 }
 0x180   :  { %v929_v33 = vpop.f32.mrf.mxu0  ;;  %1142 = vmatmul.mubr.bf16.gmra.mxu1 %v960_v27 }
 0x181   :  { %v930_v29 = vadd.f32 %v929_v33, %v857_v28  ;;  %v952_v35 = vmax.f32 %v928_v31, 0.0 }
 0x182   :  { %v933_v36 = vpop.f32.mrf.mxu0 }
 0x183   :  { %v953_v39 = vmax.f32 %v930_v29, 0.0  ;;  %v962_v46 = vpack.c.bf16 %v952_v35, %v950_v41  ;;  %v934_v11 = vadd.f32 %v933_v36, %v861_v45 }
 0x184   :  { %v935_v42 = vpop.f32.mrf.mxu0 }
 0x185   :  { %v963_v14 = vpack.c.bf16 %v953_v39, %v951_v38  ;;  %v936_v48 = vadd.f32 %v935_v42, %v863_v43  ;;  %v954_v52 = vmax.f32 %v934_v11, 0.0 }
 0x186   :  { %v937_v19 = vpop.f32.mrf.mxu0 }
 0x187   :  { %v938_v49 = vadd.f32 %v937_v19, %v865_v44  ;;  %1149 = vmatprep.mubr.bf16.mxu1 %v963_v14  ;;  %v955_v23 = vmax.f32 %v936_v48, 0.0 }
 0x188   :  { %v939_v21 = vpop.f32.mrf.mxu0  ;;  %1150 = vmatmul.mubr.bf16.gmra.mxu1 %v962_v46 }
 0x189   :  { %v940_v50 = vadd.f32 %v939_v21, %v867_v47  ;;  %v956_v20 = vmax.f32 %v938_v49, 0.0 }
 0x18b   :  { %v957_v51 = vmax.f32 %v940_v50, 0.0  ;;  %v964_v54 = vpack.c.bf16 %v956_v20, %v954_v52 }
 0x18d   :  { %v965_v53 = vpack.c.bf16 %v957_v51, %v955_v23 }
 0x18f   :  { %1157 = vmatprep.mubr.bf16.mxu1 %v965_v53 }
 0x190   :  { %1158 = vmatmul.mubr.bf16.gmra.mxu1 %v964_v54 }
 0x238   :  { %v1321_v55 = vpop.f32.mrf.mxu1 }
 0x23a   :  { %v1322_v57 = vpop.f32.mrf.mxu1 }
 0x23b   :  { %v1323_v58 = vadd.f32 %v1322_v57, %v1321_v55 }
 0x23c   :  { %v1324_v59 = vpop.f32.mrf.mxu1 }
 0x23d   :  { %v1136_v61 = vadd.f32 %v1323_v58, %v1288_v56 }
 0x23e   :  { %v1325_v62 = vpop.f32.mrf.mxu1 }
 0x23f   :  { %1166 = vst [vmem:[#allocation8] sm:$0xff] %v1136_v61  ;;  %v1326_v60 = vadd.f32 %v1325_v62, %v1324_v59 }
 0x240   :  { %v1327_v0 = vpop.f32.mrf.mxu1 }
 0x241   :  { %v1139_v2 = vadd.f32 %v1326_v60, %v1288_v56 }
 0x242   :  { %v1328_v63 = vpop.f32.mrf.mxu1 }
 0x243   :  { %1167 = vst [vmem:[#allocation8 + $0x8] sm:$0xff] %v1139_v2  ;;  %v1329_v4 = vadd.f32 %v1328_v63, %v1327_v0 }
 0x244   :  { %v1330_v6 = vpop.f32.mrf.mxu1 }
 0x245   :  { %v1144_v7 = vadd.f32 %v1329_v4, %v1288_v56 }
 0x246   :  { %v1331_v9 = vpop.f32.mrf.mxu1 }
 0x247   :  { %1168 = vst [vmem:[#allocation8 + $0x10] sm:$0xff] %v1144_v7  ;;  %v1332_v10 = vadd.f32 %v1331_v9, %v1330_v6 }
 0x248   :  { %v1333_v12 = vpop.f32.mrf.mxu1 }
 0x249   :  { %v1147_v13 = vadd.f32 %v1332_v10, %v1288_v56 }
 0x24a   :  { %v1334_v15 = vpop.f32.mrf.mxu1 }
 0x24b   :  { %1169 = vst [vmem:[#allocation8 + $0x18] sm:$0xff] %v1147_v13  ;;  %v1335_v16 = vadd.f32 %v1334_v15, %v1333_v12 }
 0x24c   :  { %v1336_v17 = vpop.f32.mrf.mxu1 }
 0x24d   :  { %v1152_v18 = vadd.f32 %v1335_v16, %v1288_v56 }
 0x24e   :  { %v1337_v24 = vpop.f32.mrf.mxu1 }
 0x24f   :  { %1170 = vst [vmem:[#allocation8 + $0x20] sm:$0xff] %v1152_v18  ;;  %v1338_v25 = vadd.f32 %v1337_v24, %v1336_v17 }
 0x250   :  { %v1339_v3 = vpop.f32.mrf.mxu1 }
 0x251   :  { %v1155_v26 = vadd.f32 %v1338_v25, %v1288_v56 }
 0x252   :  { %v1340_v27 = vpop.f32.mrf.mxu1 }
 0x253   :  { %1171 = vst [vmem:[#allocation8 + $0x28] sm:$0xff] %v1155_v26  ;;  %v1341_v5 = vadd.f32 %v1340_v27, %v1339_v3 }
 0x254   :  { %v1342_v28 = vpop.f32.mrf.mxu1 }
 0x255   :  { %v1160_v30 = vadd.f32 %v1341_v5, %v1288_v56 }
 0x256   :  { %v1343_v31 = vpop.f32.mrf.mxu1 }
 0x257   :  { %1172 = vst [vmem:[#allocation8 + $0x30] sm:$0xff] %v1160_v30  ;;  %v1344_v1 = vadd.f32 %v1343_v31, %v1342_v28 }
 0x259   :  { %v1163_v32 = vadd.f32 %v1344_v1, %v1288_v56 }
 0x25b   :  { %1173 = vst [vmem:[#allocation8 + $0x38] sm:$0xff] %v1163_v32 }
 0x25c   :  { %1586 = shalt.err (!%p1583_p5)
}
 0x25d   :  { %1185 = dma.vmem_to_hbm [thread:$0]  %s1180_s14, 1024, %s1714_s5, [#allocation4], %s1602_s21, %s1602_s21, %s1603_s22  }
 0x25e   :  { %1599 = dma.done.wait [#allocation4], 1024  }
 0x25f   :  { %1600 = vsyncadd [#allocation4], 4294966272 }
 0x260   :  { %1189 = vsyncpa [#allocation3], 1 }
 0x261   :  { %1190 = vsyncpa [#allocation6], 1 }
 0x262   :  { %1191 = vsyncpa [#allocation4], 1 }

</bundles_post_ra>
